<compile_context>
chip_gen: v6e
topology: v6e:2x2x1
jax: 0.10.0
libtpu: 0.0.40
codegen_flags: <defaults>
</compile_context>

<pallas_src>
import functools

import jax
import jax.numpy as jnp
from jax.experimental import pallas as pl
from jax.experimental.pallas import tpu as pltpu

EPS = 1e-5


def _round_up(a, b):
    return -(-a // b) * b


def fc_block_kernel(x_ref, w_ref, scale_ref, shift_ref, o_ref):
    # In-kernel cast to bf16 for the MXU (no extra HBM pass over x in the wrapper).
    x = x_ref[...].astype(jnp.bfloat16)
    # Linear (no bias): bf16 x bf16 -> f32 accumulation on the MXU.
    y = jnp.dot(x, w_ref[...], preferred_element_type=jnp.float32)
    # ReLU on the VPU (f32).
    y = jnp.maximum(y, 0.0)
    # Dropout: identity in eval mode.
    # BatchNorm1d (eval): pre-folded affine -> single fused multiply-add per output vreg.
    o_ref[...] = (y * scale_ref[...] + shift_ref[...]).astype(o_ref.dtype)


def prepare_fc_block_params(weight, gamma, beta, running_mean, running_var, eps=EPS):
    """One-time (model-load) preprocessing, hoisted out of the per-call hot path.

    weight: torch Linear weight layout (C_out, C_in).
    Returns (w_t_bf16 (C_in, C_out), scale (1, C_out) f32, shift (1, C_out) f32).
    """
    w_t = jnp.asarray(weight).T.astype(jnp.bfloat16)
    scale = gamma.astype(jnp.float32) * jax.lax.rsqrt(
        running_var.astype(jnp.float32) + eps)
    shift = beta.astype(jnp.float32) - running_mean.astype(jnp.float32) * scale
    c_out = w_t.shape[1]
    return w_t, scale.reshape(1, c_out), shift.reshape(1, c_out)


def _pick_block_m(n, c_in, c_out, in_itemsize, out_itemsize, requested,
                  vmem_budget=24 << 20):
    """VMEM-aware row tile (multiple of 8 sublanes), conservative for v7x's 64 MiB VMEM."""
    bm = max(8, (requested // 8) * 8)
    # Double-buffered x-tile + out-tile must fit the budget.
    while bm > 8 and 2 * bm * (c_in * in_itemsize + c_out * out_itemsize) > vmem_budget:
        bm //= 2
    # Don't over-allocate beyond the batch.
    bm = min(bm, _round_up(n, 8))
    # Prefer a >=2-step row grid so both v7x TensorCores are used (near-zero cost on v5e/v6e).
    if n >= 16:
        bm = min(bm, _round_up(-(-n // 2), 8))
    return max(bm, 8)


@functools.partial(jax.jit, static_argnames=("block_m",))
def fc_block(x, w_t, scale, shift, *, block_m=512):
    """x: (N, C_in) f32/bf16; w_t: (C_in, C_out) bf16; scale/shift: (1, C_out) f32."""
    n, c_in = x.shape
    c_out = w_t.shape[1]
    # Output dtype matches the input; use bf16 here if downstream tolerates it
    # (halves the dominant HBM write stream).
    out_dtype = x.dtype
    in_itemsize = int(jnp.dtype(x.dtype).itemsize)
    out_itemsize = int(jnp.dtype(out_dtype).itemsize)

    bm = _pick_block_m(n, c_in, c_out, in_itemsize, out_itemsize, block_m)
    grid = (pl.cdiv(n, bm),)

    # Explicit VMEM limit: double-buffered x/out tiles + resident weight & BN vectors,
    # with headroom; kept below v7x's 64 MiB physical VMEM.
    tile_bytes = 2 * bm * (c_in * in_itemsize + c_out * out_itemsize)
    resident_bytes = 2 * (c_in * c_out * 2 + 2 * c_out * 4)
    vmem_limit = int(min(max(2 * (tile_bytes + resident_bytes), 32 << 20), 48 << 20))

    cost = pl.CostEstimate(
        flops=2 * n * c_in * c_out,
        transcendentals=0,
        bytes_accessed=(n * c_in * in_itemsize + c_in * c_out * 2
                        + 2 * c_out * 4 + n * c_out * out_itemsize),
    )

    return pl.pallas_call(
        fc_block_kernel,
        out_shape=jax.ShapeDtypeStruct((n, c_out), out_dtype),
        grid_spec=pltpu.PrefetchScalarGridSpec(
            num_scalar_prefetch=0,
            grid=grid,
            in_specs=[
                pl.BlockSpec((bm, c_in), lambda i: (i, 0)),    # x row tile
                pl.BlockSpec((c_in, c_out), lambda i: (0, 0)),  # full weight, resident
                pl.BlockSpec((1, c_out), lambda i: (0, 0)),     # BN scale
                pl.BlockSpec((1, c_out), lambda i: (0, 0)),     # BN shift
            ],
            out_specs=pl.BlockSpec((bm, c_out), lambda i: (i, 0)),
        ),
        compiler_params=pltpu.CompilerParams(
            dimension_semantics=("parallel",),
            vmem_limit_bytes=vmem_limit),
        cost_estimate=cost,
    )(x, w_t, scale, shift)


def reference(x, w, gamma, beta, running_mean, running_var):
    # Pure-JAX f32 reference of the torch eval-mode forward (w is (C_out, C_in)).
    y = jnp.maximum(x @ w.T, 0.0)
    return gamma * (y - running_mean) / jnp.sqrt(running_var + EPS) + beta


if __name__ == "__main__":
    # Shapes consistent with FCBlock(in_channels=32, out_channels=64); N=1024 gives a
    # 2-step row grid at block_m=512 (keeps both v7x TensorCores busy).
    N, C_IN, C_OUT = 1024, 32, 64
    key = jax.random.PRNGKey(0)
    kx, kw, kg, kb, km, kv = jax.random.split(key, 6)

    x = jax.random.normal(kx, (N, C_IN), dtype=jnp.float32)
    # torch Linear weight layout is (C_out, C_in).
    w = jax.random.normal(kw, (C_OUT, C_IN), dtype=jnp.float32) * (1.0 / jnp.sqrt(C_IN))
    # Non-trivial BN parameters/statistics so the affine path is actually exercised.
    gamma = 1.0 + 0.1 * jax.random.normal(kg, (C_OUT,), dtype=jnp.float32)
    beta = 0.1 * jax.random.normal(kb, (C_OUT,), dtype=jnp.float32)
    running_mean = 0.1 * jax.random.normal(km, (C_OUT,), dtype=jnp.float32)
    running_var = jnp.abs(1.0 + 0.1 * jax.random.normal(kv, (C_OUT,), dtype=jnp.float32))

    # One-time (model-load) preprocessing, outside the per-call hot path.
    w_t, scale, shift = prepare_fc_block_params(w, gamma, beta, running_mean, running_var)

    ref = reference(x, w, gamma, beta, running_mean, running_var)

    out = jax.block_until_ready(fc_block(x, w_t, scale, shift))
    assert out.shape == (N, C_OUT)
    # Tolerance loosened for the bf16 MXU inputs (f32 accumulation).
    assert jnp.allclose(out, ref, atol=2e-2, rtol=2e-2), "mismatch vs reference"

    # Ragged batch (N not a multiple of the row tile) exercises the cdiv grid path.
    n_ragged = 1000
    out_r = jax.block_until_ready(fc_block(x[:n_ragged], w_t, scale, shift))
    assert out_r.shape == (n_ragged, C_OUT)
    assert jnp.allclose(out_r, ref[:n_ragged], atol=2e-2, rtol=2e-2), "ragged mismatch"

    print("KERNEL_OK")
</pallas_src>

<mosaic_0001>
module attributes {stable_mosaic.version = 11 : i64} {
  func.func @fc_block_kernel(%arg0: i32, %arg1: memref<512x32xf32, #tpu.memory_space<vmem>>, %arg2: memref<32x64xbf16, #tpu.memory_space<vmem>>, %arg3: memref<1x64xf32, #tpu.memory_space<vmem>>, %arg4: memref<1x64xf32, #tpu.memory_space<vmem>>, %arg5: memref<512x64xf32, #tpu.memory_space<vmem>>) attributes {dimension_semantics = [#tpu.dimension_semantics<parallel>], iteration_bounds = array<i64: 2>, scalar_prefetch = 0 : i64, scratch_operands = 0 : i64, tpu.core_type = #tpu.core_type<tc>, window_params = [{transform_indices = @transform_0, window_bounds = array<i64: 512, 32>}, {pipeline_mode = #tpu.pipeline_mode<synchronous>, transform_indices = @transform_1, window_bounds = array<i64: 32, 64>}, {pipeline_mode = #tpu.pipeline_mode<synchronous>, transform_indices = @transform_2, window_bounds = array<i64: 1, 64>}, {pipeline_mode = #tpu.pipeline_mode<synchronous>, transform_indices = @transform_3, window_bounds = array<i64: 1, 64>}, {transform_indices = @transform_4, window_bounds = array<i64: 512, 64>}]} {
    %c0 = arith.constant 0 : index
    %c0_0 = arith.constant 0 : index
    %0 = vector.load %arg1[%c0, %c0_0] : memref<512x32xf32, #tpu.memory_space<vmem>>, vector<512x32xf32>
    %1 = arith.truncf %0 : vector<512x32xf32> to vector<512x32xbf16>
    %c0_1 = arith.constant 0 : index
    %c0_2 = arith.constant 0 : index
    %2 = vector.load %arg2[%c0_1, %c0_2] : memref<32x64xbf16, #tpu.memory_space<vmem>>, vector<32x64xbf16>
    %cst = arith.constant dense<0.000000e+00> : vector<512x64xf32>
    %3 = tpu.matmul %1, %2, %cst {dimension_numbers = #tpu.dot_dimension_numbers<[1], [0], [0], [1], [0, 0, 1, 1], [], []>} : vector<512x32xbf16>, vector<32x64xbf16>, vector<512x64xf32> -> vector<512x64xf32>
    %cst_3 = arith.constant 0.000000e+00 : f32
    %4 = vector.broadcast %cst_3 : f32 to vector<512x64xf32>
    %5 = arith.maximumf %3, %4 : vector<512x64xf32>
    %c0_4 = arith.constant 0 : index
    %c0_5 = arith.constant 0 : index
    %6 = vector.load %arg3[%c0_4, %c0_5] : memref<1x64xf32, #tpu.memory_space<vmem>>, vector<1x64xf32>
    %7 = vector.broadcast %6 : vector<1x64xf32> to vector<512x64xf32>
    %8 = arith.mulf %5, %7 : vector<512x64xf32>
    %c0_6 = arith.constant 0 : index
    %c0_7 = arith.constant 0 : index
    %9 = vector.load %arg4[%c0_6, %c0_7] : memref<1x64xf32, #tpu.memory_space<vmem>>, vector<1x64xf32>
    %10 = vector.broadcast %9 : vector<1x64xf32> to vector<512x64xf32>
    %11 = arith.addf %8, %10 : vector<512x64xf32>
    %c0_8 = arith.constant 0 : index
    %c0_9 = arith.constant 0 : index
    %12 = vector.load %arg5[%c0_8, %c0_9] : memref<512x64xf32, #tpu.memory_space<vmem>>, vector<512x64xf32>
    tpu.vector_store %arg5[%c0_8, %c0_9], %11 {strides = array<i32>} : memref<512x64xf32, #tpu.memory_space<vmem>>, vector<512x64xf32>,
    return
  }
  func.func @transform_0(%arg0: i32) -> (i32, i32) {
    %c0_i32 = arith.constant 0 : i32
    %c0_i32_0 = arith.constant 0 : i32
    return %arg0, %c0_i32 : i32, i32
  }
  func.func @transform_1(%arg0: i32) -> (i32, i32) {
    %c0_i32 = arith.constant 0 : i32
    %c0_i32_0 = arith.constant 0 : i32
    %c0_i32_1 = arith.constant 0 : i32
    return %c0_i32, %c0_i32_0 : i32, i32
  }
  func.func @transform_2(%arg0: i32) -> (i32, i32) {
    %c0_i32 = arith.constant 0 : i32
    %c0_i32_0 = arith.constant 0 : i32
    %c0_i32_1 = arith.constant 0 : i32
    return %c0_i32, %c0_i32_0 : i32, i32
  }
  func.func @transform_3(%arg0: i32) -> (i32, i32) {
    %c0_i32 = arith.constant 0 : i32
    %c0_i32_0 = arith.constant 0 : i32
    %c0_i32_1 = arith.constant 0 : i32
    return %c0_i32, %c0_i32_0 : i32, i32
  }
  func.func @transform_4(%arg0: i32) -> (i32, i32) {
    %c0_i32 = arith.constant 0 : i32
    %c0_i32_0 = arith.constant 0 : i32
    return %arg0, %c0_i32 : i32, i32
  }
}

</mosaic_0001>

<bundles_post_ra>
// kernel: fc_block.1
= control target key start
LH: loop header
LB: loop body
LE: loop exit
PB: predicated region body
PF: predicated region fallthrough
CT: control target
= control target key end

     0   :  { %s1223_s15 = smov 0   ;;  %s1619_s0 = inlined_call_operand.vmem [shape: f32[1024,32], index: 0, kind: input, shape index: {}]   ;;  %s1620_s1 = inlined_call_operand.vmem [shape: bf16[32,64], index: 1, kind: input, shape index: {}]   ;;  %s1621_s2 = inlined_call_operand.vmem [shape: f32[1,64], index: 2, kind: input, shape index: {}]   ;;  %s1622_s3 = inlined_call_operand.vmem [shape: f32[1,64], index: 3, kind: input, shape index: {}]   ;;  %s1623_s4 = inlined_call_operand.vmem [shape: f32[1024,64], index: 4, kind: output, shape index: {}]  }
   0x1 LB: > { %s1027_s16 = sadd.s32 4294967295, %s1196_s15   ;;  %p1031_p0 = scmp.ge.s32.totalorder %s1196_s15, 1  ;;  %s1196_s15 = sphi %s1223_s15, %s14_s15  }
   0x2   : > { %p163_p1 = scmp.lt.s32.totalorder %s1196_s15, 3 }
   0x4   : > { %p164_p2 = pnand %p1031_p0, %p163_p1 }
   0x5   : > { %s1032_s19 = sshll.u32 (!%p164_p2), %s1027_s16, 6 }
   0x6   : > { %167 = sbr.rel (%p164_p2) target bundleno = 283 (0x11b), region = 36  ;;  %p190_p3 = scmp.lt.s32.totalorder (!%p164_p2), %s1032_s19, 127 }
   0xb   : > { %v1188_v0 = vld [vmem:[%s1620_s1 + $0x8] sm:$0xff]   ;;  %v1189_v1 = vld [vmem:[%s1620_s1] sm:$0xff]   ;;  %s1625_s19 = smov (!%p190_p3, %s1032_s19), 127  ;;  %vm314_vm0 = vcmask 261120   ;;  %vm906_vm1 = vcmask 523264  }
   0xc   : > { %1108 = vmatprep.subr.bf16.mxu0 %v1188_v0  ;;  %1176 = vmatprep.subr.bf16.mxu1 %v1188_v0  ;;  %s1033_s22 = sshll.u32 %s1625_s19, 3 }
   0xd   : > { %1109 = vmatpush3.bf16.msra.mxu0 %v1188_v0  ;;  %1178 = vmatpush3.bf16.msra.mxu1 %v1188_v0  ;;  %s1245_s25 = scalar_lea.vmem %s1619_s0, %s1033_s22  ;;  %s1359_s6 = scalar_lea.vmem %s1623_s4, %s1033_s22 }
   0xe   : > { %1110 = vmatprep.subr.bf16.mxu0 %v1189_v1  ;;  %1177 = vmatprep.subr.bf16.mxu1 %v1189_v1  ;;  %v202_v2 = vld [vmem:[%s1245_s25] sm:$0xff]  ;;  %v203_v3 = vld [vmem:[%s1245_s25 + $0x8] sm:$0xff]  ;;  %v204_v7 = vld [vmem:[%s1245_s25 + $0x10] sm:$0xff] }
   0xf   : > { %v234_v4 = vld [vmem:[%s1245_s25 + $0x100] sm:$0xff]  ;;  %v266_v5 = vpack.c.bf16 %v203_v3, %v202_v2  ;;  %v235_v6 = vld [vmem:[%s1245_s25 + $0x108] sm:$0xff]  ;;  %v205_v8 = vld [vmem:[%s1245_s25 + $0x18] sm:$0xff] }
  0x10   : > { %v282_v9 = vpack.c.bf16 %v235_v6, %v234_v4  ;;  %v267_v10 = vpack.c.bf16 %v205_v8, %v204_v7  ;;  %v236_v11 = vld [vmem:[%s1245_s25 + $0x110] sm:$0xff]  ;;  %v237_v12 = vld [vmem:[%s1245_s25 + $0x118] sm:$0xff]  ;;  %v206_v13 = vld [vmem:[%s1245_s25 + $0x20] sm:$0xff] }
  0x11   : > { %1111 = vmatpush3.bf16.msra.mxu0 %v1189_v1  ;;  %1179 = vmatpush3.bf16.msra.mxu1 %v1189_v1  ;;  %v283_v14 = vpack.c.bf16 %v237_v12, %v236_v11  ;;  %v207_v15 = vld [vmem:[%s1245_s25 + $0x28] sm:$0xff]  ;;  %v238_v16 = vld [vmem:[%s1245_s25 + $0x120] sm:$0xff]  ;;  %v208_v20 = vld [vmem:[%s1245_s25 + $0x30] sm:$0xff] }
  0x12   : > { %1112 = vmatprep.mubr.msk.bf16.mxu0 %vm314_vm0, %v266_v5  ;;  %v239_v17 = vld [vmem:[%s1245_s25 + $0x128] sm:$0xff]  ;;  %1144 = vmatprep.mubr.msk.bf16.mxu1 %vm314_vm0, %v282_v9  ;;  %v268_v18 = vpack.c.bf16 %v207_v15, %v206_v13  ;;  %v209_v21 = vld [vmem:[%s1245_s25 + $0x38] sm:$0xff]  ;;  %v240_v22 = vld [vmem:[%s1245_s25 + $0x130] sm:$0xff] }
  0x13   : > { %v284_v19 = vpack.c.bf16 %v239_v17, %v238_v16  ;;  %v241_v23 = vld [vmem:[%s1245_s25 + $0x138] sm:$0xff]  ;;  %v210_v24 = vld [vmem:[%s1245_s25 + $0x40] sm:$0xff]  ;;  %v211_v25 = vld [vmem:[%s1245_s25 + $0x48] sm:$0xff]  ;;  %v269_v28 = vpack.c.bf16 %v209_v21, %v208_v20 }
  0x14   : > { %1113 = vmatmul.mubr.msk.bf16.vlgmr.msra.gmra.mxu0 %vm314_vm0, %v267_v10  ;;  %1145 = vmatmul.mubr.msk.bf16.vlgmr.msra.gmra.mxu1 %vm314_vm0, %v283_v14  ;;  %v242_v26 = vld [vmem:[%s1245_s25 + $0x140] sm:$0xff]  ;;  %v243_v27 = vld [vmem:[%s1245_s25 + $0x148] sm:$0xff]  ;;  %v285_v29 = vpack.c.bf16 %v241_v23, %v240_v22  ;;  %v270_v30 = vpack.c.bf16 %v211_v25, %v210_v24  ;;  %v212_v32 = vld [vmem:[%s1245_s25 + $0x50] sm:$0xff] }
  0x15   : > { %1116 = vmatprep.mubr.msk.bf16.mxu0 %vm314_vm0, %v268_v18  ;;  %1148 = vmatprep.mubr.msk.bf16.mxu1 %vm314_vm0, %v284_v19  ;;  %v286_v31 = vpack.c.bf16 %v243_v27, %v242_v26  ;;  %v213_v33 = vld [vmem:[%s1245_s25 + $0x58] sm:$0xff]  ;;  %v244_v34 = vld [vmem:[%s1245_s25 + $0x150] sm:$0xff]  ;;  %v214_v36 = vld [vmem:[%s1245_s25 + $0x60] sm:$0xff] }
  0x16   : > { %v245_v35 = vld [vmem:[%s1245_s25 + $0x158] sm:$0xff]  ;;  %v215_v37 = vld [vmem:[%s1245_s25 + $0x68] sm:$0xff]  ;;  %v246_v38 = vld [vmem:[%s1245_s25 + $0x160] sm:$0xff]  ;;  %v271_v40 = vpack.c.bf16 %v213_v33, %v212_v32 }
  0x17   : > { %v247_v39 = vld [vmem:[%s1245_s25 + $0x168] sm:$0xff]  ;;  %v287_v41 = vpack.c.bf16 %v245_v35, %v244_v34  ;;  %v272_v42 = vpack.c.bf16 %v215_v37, %v214_v36  ;;  %v216_v44 = vld [vmem:[%s1245_s25 + $0x70] sm:$0xff]  ;;  %v217_v45 = vld [vmem:[%s1245_s25 + $0x78] sm:$0xff] }
  0x18   : > { %v288_v43 = vpack.c.bf16 %v247_v39, %v246_v38  ;;  %v248_v46 = vld [vmem:[%s1245_s25 + $0x170] sm:$0xff]  ;;  %v249_v47 = vld [vmem:[%s1245_s25 + $0x178] sm:$0xff]  ;;  %v218_v48 = vld [vmem:[%s1245_s25 + $0x80] sm:$0xff]  ;;  %v273_v52 = vpack.c.bf16 %v217_v45, %v216_v44 }
  0x19   : > { %v219_v49 = vld [vmem:[%s1245_s25 + $0x88] sm:$0xff]  ;;  %v250_v50 = vld [vmem:[%s1245_s25 + $0x180] sm:$0xff]  ;;  %v289_v53 = vpack.c.bf16 %v249_v47, %v248_v46  ;;  %v220_v56 = vld [vmem:[%s1245_s25 + $0x90] sm:$0xff] }
  0x1a   : > { %v251_v51 = vld [vmem:[%s1245_s25 + $0x188] sm:$0xff]  ;;  %v274_v54 = vpack.c.bf16 %v219_v49, %v218_v48  ;;  %v221_v57 = vld [vmem:[%s1245_s25 + $0x98] sm:$0xff]  ;;  %v252_v58 = vld [vmem:[%s1245_s25 + $0x190] sm:$0xff] }
  0x1b   : > { %v290_v55 = vpack.c.bf16 %v251_v51, %v250_v50  ;;  %v253_v59 = vld [vmem:[%s1245_s25 + $0x198] sm:$0xff]  ;;  %v222_v60 = vld [vmem:[%s1245_s25 + $0xa0] sm:$0xff]  ;;  %v223_v61 = vld [vmem:[%s1245_s25 + $0xa8] sm:$0xff]  ;;  %v275_v0 = vpack.c.bf16 %v221_v57, %v220_v56 }
  0x1c   : > { %1117 = vmatmul.mubr.msk.bf16.gmra.mxu0 %vm314_vm0, %v269_v28  ;;  %1149 = vmatmul.mubr.msk.bf16.gmra.mxu1 %vm314_vm0, %v285_v29  ;;  %v254_v62 = vld [vmem:[%s1245_s25 + $0x1a0] sm:$0xff]  ;;  %v255_v63 = vld [vmem:[%s1245_s25 + $0x1a8] sm:$0xff]  ;;  %v291_v1 = vpack.c.bf16 %v253_v59, %v252_v58  ;;  %v276_v2 = vpack.c.bf16 %v223_v61, %v222_v60  ;;  %v224_v4 = vld [vmem:[%s1245_s25 + $0xb0] sm:$0xff] }
  0x1d   : > { %1120 = vmatprep.mubr.msk.bf16.mxu0 %vm314_vm0, %v270_v30  ;;  %1152 = vmatprep.mubr.msk.bf16.mxu1 %vm314_vm0, %v286_v31  ;;  %v292_v3 = vpack.c.bf16 %v255_v63, %v254_v62  ;;  %v225_v5 = vld [vmem:[%s1245_s25 + $0xb8] sm:$0xff]  ;;  %v256_v6 = vld [vmem:[%s1245_s25 + $0x1b0] sm:$0xff]  ;;  %v226_v8 = vld [vmem:[%s1245_s25 + $0xc0] sm:$0xff] }
  0x1e   : > { %v257_v7 = vld [vmem:[%s1245_s25 + $0x1b8] sm:$0xff]  ;;  %v227_v9 = vld [vmem:[%s1245_s25 + $0xc8] sm:$0xff]  ;;  %v258_v10 = vld [vmem:[%s1245_s25 + $0x1c0] sm:$0xff]  ;;  %v277_v12 = vpack.c.bf16 %v225_v5, %v224_v4 }
  0x1f   : > { %v259_v11 = vld [vmem:[%s1245_s25 + $0x1c8] sm:$0xff]  ;;  %v293_v13 = vpack.c.bf16 %v257_v7, %v256_v6  ;;  %v278_v14 = vpack.c.bf16 %v227_v9, %v226_v8  ;;  %v228_v16 = vld [vmem:[%s1245_s25 + $0xd0] sm:$0xff]  ;;  %v229_v17 = vld [vmem:[%s1245_s25 + $0xd8] sm:$0xff] }
  0x20   : > { %v294_v15 = vpack.c.bf16 %v259_v11, %v258_v10  ;;  %v260_v18 = vld [vmem:[%s1245_s25 + $0x1d0] sm:$0xff]  ;;  %v261_v19 = vld [vmem:[%s1245_s25 + $0x1d8] sm:$0xff]  ;;  %v230_v20 = vld [vmem:[%s1245_s25 + $0xe0] sm:$0xff]  ;;  %v279_v24 = vpack.c.bf16 %v229_v17, %v228_v16 }
  0x21   : > { %v231_v21 = vld [vmem:[%s1245_s25 + $0xe8] sm:$0xff]  ;;  %v262_v22 = vld [vmem:[%s1245_s25 + $0x1e0] sm:$0xff]  ;;  %v295_v25 = vpack.c.bf16 %v261_v19, %v260_v18  ;;  %v232_v28 = vld [vmem:[%s1245_s25 + $0xf0] sm:$0xff] }
  0x22   : > { %v263_v23 = vld [vmem:[%s1245_s25 + $0x1e8] sm:$0xff]  ;;  %v280_v26 = vpack.c.bf16 %v231_v21, %v230_v20  ;;  %v233_v29 = vld [vmem:[%s1245_s25 + $0xf8] sm:$0xff]  ;;  %v264_v30 = vld [vmem:[%s1245_s25 + $0x1f0] sm:$0xff] }
  0x23   : > { %v296_v27 = vpack.c.bf16 %v263_v23, %v262_v22  ;;  %v265_v31 = vld [vmem:[%s1245_s25 + $0x1f8] sm:$0xff]  ;;  %v281_v32 = vpack.c.bf16 %v233_v29, %v232_v28  ;;  %v1346_v35 = vld [vmem:[%s1621_s2] ss:$0 sm:$0xff] }
  0x24   : > { %1121 = vmatmul.mubr.msk.bf16.gmra.mxu0 %vm314_vm0, %v271_v40  ;;  %1153 = vmatmul.mubr.msk.bf16.gmra.mxu1 %vm314_vm0, %v287_v41  ;;  %v297_v33 = vpack.c.bf16 %v265_v31, %v264_v30  ;;  %v1351_v38 = vld [vmem:[%s1622_s3] ss:$0 sm:$0xff] }
  0x25   : > { %1124 = vmatprep.mubr.msk.bf16.mxu0 %vm314_vm0, %v272_v42  ;;  %1156 = vmatprep.mubr.msk.bf16.mxu1 %vm314_vm0, %v288_v43 }
  0x2c   : > { %1125 = vmatmul.mubr.msk.bf16.gmra.mxu0 %vm314_vm0, %v273_v52  ;;  %1157 = vmatmul.mubr.msk.bf16.gmra.mxu1 %vm314_vm0, %v289_v53 }
  0x2d   : > { %1128 = vmatprep.mubr.msk.bf16.mxu0 %vm314_vm0, %v274_v54  ;;  %1160 = vmatprep.mubr.msk.bf16.mxu1 %vm314_vm0, %v290_v55 }
  0x34   : > { %1129 = vmatmul.mubr.msk.bf16.gmra.mxu0 %vm314_vm0, %v275_v0  ;;  %1161 = vmatmul.mubr.msk.bf16.gmra.mxu1 %vm314_vm0, %v291_v1 }
  0x35   : > { %1132 = vmatprep.mubr.msk.bf16.mxu0 %vm314_vm0, %v276_v2  ;;  %1164 = vmatprep.mubr.msk.bf16.mxu1 %vm314_vm0, %v292_v3 }
  0x3c   : > { %1133 = vmatmul.mubr.msk.bf16.gmra.mxu0 %vm314_vm0, %v277_v12  ;;  %1165 = vmatmul.mubr.msk.bf16.gmra.mxu1 %vm314_vm0, %v293_v13 }
  0x3d   : > { %1136 = vmatprep.mubr.msk.bf16.mxu0 %vm314_vm0, %v278_v14  ;;  %1168 = vmatprep.mubr.msk.bf16.mxu1 %vm314_vm0, %v294_v15 }
  0x44   : > { %1137 = vmatmul.mubr.msk.bf16.gmra.mxu0 %vm314_vm0, %v279_v24  ;;  %1169 = vmatmul.mubr.msk.bf16.gmra.mxu1 %vm314_vm0, %v295_v25 }
  0x45   : > { %1140 = vmatprep.mubr.msk.bf16.mxu0 %vm314_vm0, %v280_v26  ;;  %1172 = vmatprep.mubr.msk.bf16.mxu1 %vm314_vm0, %v296_v27 }
  0x4c   : > { %1141 = vmatmul.mubr.msk.bf16.gmra.mxu0 %vm314_vm0, %v281_v32  ;;  %1173 = vmatmul.mubr.msk.bf16.gmra.mxu1 %vm314_vm0, %v297_v33 }
  0xd4   : > { %v1114_v34 = vpop.f32.mrf.mxu0  ;;  %v1146_v37 = vpop.f32.mrf.mxu1 }
  0xd5   : > { %v702_v36 = vmax.f32 %v1114_v34, 0.0  ;;  %v734_v39 = vmax.f32 %v1146_v37, 0.0 }
  0xd6   : > { %v445_v40 = vpop.f32.mrf.mxu0  ;;  %v573_v43 = vpop.f32.mrf.mxu1 }
  0xd7   : > { %v773_v41 = vmul.f32 %v1346_v35, %v702_v36  ;;  %v700_v42 = vmax.f32 %v445_v40, 0.0  ;;  %v805_v44 = vmul.f32 %v1346_v35, %v734_v39  ;;  %v732_v45 = vmax.f32 %v573_v43, 0.0 }
  0xd8   : > { %v1115_v46 = vpop.f32.mrf.mxu0  ;;  %v1147_v50 = vpop.f32.mrf.mxu1 }
  0xd9   : > { %v844_v47 = vadd.f32 %v1351_v38, %v773_v41  ;;  %v771_v48 = vmul.f32 %v1346_v35, %v700_v42  ;;  %v703_v49 = vmax.f32 %v1115_v46, 0.0  ;;  %v876_v51 = vadd.f32 %v1351_v38, %v805_v44 }
  0xda   : > { %v803_v52 = vmul.f32 %v1346_v35, %v732_v45  ;;  %v735_v53 = vmax.f32 %v1147_v50, 0.0  ;;  %v448_v54 = vpop.f32.mrf.mxu0  ;;  %v576_v58 = vpop.f32.mrf.mxu1 }
  0xdb   : > { %909 = vst.msk [vmem:[%s1359_s6 + $0x10] sm:$0xff] %vm906_vm1, %v844_v47  ;;  %v842_v55 = vadd.f32 %v1351_v38, %v771_v48  ;;  %v774_v56 = vmul.f32 %v1346_v35, %v703_v49  ;;  %v701_v57 = vmax.f32 %v448_v54, 0.0  ;;  %941 = vst.msk [vmem:[%s1359_s6 + $0x110] sm:$0xff] %vm906_vm1, %v876_v51  ;;  %v733_v61 = vmax.f32 %v576_v58, 0.0 }
  0xdc   : > { %v874_v59 = vadd.f32 %v1351_v38, %v803_v52  ;;  %v806_v60 = vmul.f32 %v1346_v35, %v735_v53  ;;  %v1118_v62 = vpop.f32.mrf.mxu0  ;;  %v1150_v2 = vpop.f32.mrf.mxu1 }
  0xdd   : > { %907 = vst.msk [vmem:[%s1359_s6] sm:$0xff] %vm906_vm1, %v842_v55  ;;  %v845_v63 = vadd.f32 %v1351_v38, %v774_v56  ;;  %v772_v0 = vmul.f32 %v1346_v35, %v701_v57  ;;  %v706_v1 = vmax.f32 %v1118_v62, 0.0  ;;  %v804_v4 = vmul.f32 %v1346_v35, %v733_v61 }
  0xde   : > { %939 = vst.msk [vmem:[%s1359_s6 + $0x100] sm:$0xff] %vm906_vm1, %v874_v59  ;;  %v877_v3 = vadd.f32 %v1351_v38, %v806_v60  ;;  %v738_v5 = vmax.f32 %v1150_v2, 0.0  ;;  %v461_v6 = vpop.f32.mrf.mxu0  ;;  %v589_v10 = vpop.f32.mrf.mxu1 }
  0xdf   : > { %910 = vst.msk [vmem:[%s1359_s6 + $0x18] sm:$0xff] %vm906_vm1, %v845_v63  ;;  %v843_v7 = vadd.f32 %v1351_v38, %v772_v0  ;;  %v777_v8 = vmul.f32 %v1346_v35, %v706_v1  ;;  %v704_v9 = vmax.f32 %v461_v6, 0.0  ;;  %v875_v11 = vadd.f32 %v1351_v38, %v804_v4 }
  0xe0   : > { %942 = vst.msk [vmem:[%s1359_s6 + $0x118] sm:$0xff] %vm906_vm1, %v877_v3  ;;  %v809_v12 = vmul.f32 %v1346_v35, %v738_v5  ;;  %v736_v13 = vmax.f32 %v589_v10, 0.0  ;;  %v1119_v14 = vpop.f32.mrf.mxu0  ;;  %v1151_v18 = vpop.f32.mrf.mxu1 }
  0xe1   : > { %908 = vst.msk [vmem:[%s1359_s6 + $0x8] sm:$0xff] %vm906_vm1, %v843_v7  ;;  %v848_v15 = vadd.f32 %v1351_v38, %v777_v8  ;;  %v775_v16 = vmul.f32 %v1346_v35, %v704_v9  ;;  %v707_v17 = vmax.f32 %v1119_v14, 0.0  ;;  %940 = vst.msk [vmem:[%s1359_s6 + $0x108] sm:$0xff] %vm906_vm1, %v875_v11  ;;  %v739_v21 = vmax.f32 %v1151_v18, 0.0 }
  0xe2   : > { %v880_v19 = vadd.f32 %v1351_v38, %v809_v12  ;;  %v807_v20 = vmul.f32 %v1346_v35, %v736_v13  ;;  %v464_v22 = vpop.f32.mrf.mxu0  ;;  %v592_v26 = vpop.f32.mrf.mxu1 }
  0xe3   : > { %913 = vst.msk [vmem:[%s1359_s6 + $0x30] sm:$0xff] %vm906_vm1, %v848_v15  ;;  %v846_v23 = vadd.f32 %v1351_v38, %v775_v16  ;;  %v778_v24 = vmul.f32 %v1346_v35, %v707_v17  ;;  %v705_v25 = vmax.f32 %v464_v22, 0.0  ;;  %v810_v28 = vmul.f32 %v1346_v35, %v739_v21 }
  0xe4   : > { %945 = vst.msk [vmem:[%s1359_s6 + $0x130] sm:$0xff] %vm906_vm1, %v880_v19  ;;  %v878_v27 = vadd.f32 %v1351_v38, %v807_v20  ;;  %v737_v29 = vmax.f32 %v592_v26, 0.0  ;;  %v1122_v30 = vpop.f32.mrf.mxu0  ;;  %v1154_v34 = vpop.f32.mrf.mxu1 }
  0xe5   : > { %911 = vst.msk [vmem:[%s1359_s6 + $0x20] sm:$0xff] %vm906_vm1, %v846_v23  ;;  %v849_v31 = vadd.f32 %v1351_v38, %v778_v24  ;;  %v776_v32 = vmul.f32 %v1346_v35, %v705_v25  ;;  %v710_v33 = vmax.f32 %v1122_v30, 0.0  ;;  %v881_v36 = vadd.f32 %v1351_v38, %v810_v28 }
  0xe6   : > { %943 = vst.msk [vmem:[%s1359_s6 + $0x120] sm:$0xff] %vm906_vm1, %v878_v27  ;;  %v808_v37 = vmul.f32 %v1346_v35, %v737_v29  ;;  %v742_v39 = vmax.f32 %v1154_v34, 0.0  ;;  %v477_v40 = vpop.f32.mrf.mxu0  ;;  %v605_v44 = vpop.f32.mrf.mxu1 }
  0xe7   : > { %914 = vst.msk [vmem:[%s1359_s6 + $0x38] sm:$0xff] %vm906_vm1, %v849_v31  ;;  %v847_v41 = vadd.f32 %v1351_v38, %v776_v32  ;;  %v781_v42 = vmul.f32 %v1346_v35, %v710_v33  ;;  %v708_v43 = vmax.f32 %v477_v40, 0.0  ;;  %946 = vst.msk [vmem:[%s1359_s6 + $0x138] sm:$0xff] %vm906_vm1, %v881_v36  ;;  %v740_v47 = vmax.f32 %v605_v44, 0.0 }
  0xe8   : > { %v879_v45 = vadd.f32 %v1351_v38, %v808_v37  ;;  %v813_v46 = vmul.f32 %v1346_v35, %v742_v39  ;;  %v1123_v48 = vpop.f32.mrf.mxu0  ;;  %v1155_v52 = vpop.f32.mrf.mxu1 }
  0xe9   : > { %912 = vst.msk [vmem:[%s1359_s6 + $0x28] sm:$0xff] %vm906_vm1, %v847_v41  ;;  %v852_v49 = vadd.f32 %v1351_v38, %v781_v42  ;;  %v779_v50 = vmul.f32 %v1346_v35, %v708_v43  ;;  %v711_v51 = vmax.f32 %v1123_v48, 0.0  ;;  %v811_v54 = vmul.f32 %v1346_v35, %v740_v47 }
  0xea   : > { %944 = vst.msk [vmem:[%s1359_s6 + $0x128] sm:$0xff] %vm906_vm1, %v879_v45  ;;  %v884_v53 = vadd.f32 %v1351_v38, %v813_v46  ;;  %v743_v55 = vmax.f32 %v1155_v52, 0.0  ;;  %v480_v56 = vpop.f32.mrf.mxu0  ;;  %v608_v60 = vpop.f32.mrf.mxu1 }
  0xeb   : > { %917 = vst.msk [vmem:[%s1359_s6 + $0x50] sm:$0xff] %vm906_vm1, %v852_v49  ;;  %v850_v57 = vadd.f32 %v1351_v38, %v779_v50  ;;  %v782_v58 = vmul.f32 %v1346_v35, %v711_v51  ;;  %v709_v59 = vmax.f32 %v480_v56, 0.0  ;;  %v882_v61 = vadd.f32 %v1351_v38, %v811_v54 }
  0xec   : > { %949 = vst.msk [vmem:[%s1359_s6 + $0x150] sm:$0xff] %vm906_vm1, %v884_v53  ;;  %v814_v62 = vmul.f32 %v1346_v35, %v743_v55  ;;  %v741_v63 = vmax.f32 %v608_v60, 0.0  ;;  %v1126_v0 = vpop.f32.mrf.mxu0  ;;  %v1158_v4 = vpop.f32.mrf.mxu1 }
  0xed   : > { %915 = vst.msk [vmem:[%s1359_s6 + $0x40] sm:$0xff] %vm906_vm1, %v850_v57  ;;  %v853_v1 = vadd.f32 %v1351_v38, %v782_v58  ;;  %v780_v2 = vmul.f32 %v1346_v35, %v709_v59  ;;  %v714_v3 = vmax.f32 %v1126_v0, 0.0  ;;  %947 = vst.msk [vmem:[%s1359_s6 + $0x140] sm:$0xff] %vm906_vm1, %v882_v61  ;;  %v746_v7 = vmax.f32 %v1158_v4, 0.0 }
  0xee   : > { %v885_v5 = vadd.f32 %v1351_v38, %v814_v62  ;;  %v812_v6 = vmul.f32 %v1346_v35, %v741_v63  ;;  %v493_v8 = vpop.f32.mrf.mxu0  ;;  %v621_v12 = vpop.f32.mrf.mxu1 }
  0xef   : > { %918 = vst.msk [vmem:[%s1359_s6 + $0x58] sm:$0xff] %vm906_vm1, %v853_v1  ;;  %v851_v9 = vadd.f32 %v1351_v38, %v780_v2  ;;  %v785_v10 = vmul.f32 %v1346_v35, %v714_v3  ;;  %v712_v11 = vmax.f32 %v493_v8, 0.0  ;;  %v817_v14 = vmul.f32 %v1346_v35, %v746_v7 }
  0xf0   : > { %950 = vst.msk [vmem:[%s1359_s6 + $0x158] sm:$0xff] %vm906_vm1, %v885_v5  ;;  %v883_v13 = vadd.f32 %v1351_v38, %v812_v6  ;;  %v744_v15 = vmax.f32 %v621_v12, 0.0  ;;  %v1127_v16 = vpop.f32.mrf.mxu0  ;;  %v1159_v20 = vpop.f32.mrf.mxu1 }
  0xf1   : > { %916 = vst.msk [vmem:[%s1359_s6 + $0x48] sm:$0xff] %vm906_vm1, %v851_v9  ;;  %v856_v17 = vadd.f32 %v1351_v38, %v785_v10  ;;  %v783_v18 = vmul.f32 %v1346_v35, %v712_v11  ;;  %v715_v19 = vmax.f32 %v1127_v16, 0.0  ;;  %v888_v21 = vadd.f32 %v1351_v38, %v817_v14 }
  0xf2   : > { %948 = vst.msk [vmem:[%s1359_s6 + $0x148] sm:$0xff] %vm906_vm1, %v883_v13  ;;  %v815_v22 = vmul.f32 %v1346_v35, %v744_v15  ;;  %v747_v23 = vmax.f32 %v1159_v20, 0.0  ;;  %v496_v24 = vpop.f32.mrf.mxu0  ;;  %v624_v28 = vpop.f32.mrf.mxu1 }
  0xf3   : > { %921 = vst.msk [vmem:[%s1359_s6 + $0x70] sm:$0xff] %vm906_vm1, %v856_v17  ;;  %v854_v25 = vadd.f32 %v1351_v38, %v783_v18  ;;  %v786_v26 = vmul.f32 %v1346_v35, %v715_v19  ;;  %v713_v27 = vmax.f32 %v496_v24, 0.0  ;;  %953 = vst.msk [vmem:[%s1359_s6 + $0x170] sm:$0xff] %vm906_vm1, %v888_v21  ;;  %v745_v31 = vmax.f32 %v624_v28, 0.0 }
  0xf4   : > { %v886_v29 = vadd.f32 %v1351_v38, %v815_v22  ;;  %v818_v30 = vmul.f32 %v1346_v35, %v747_v23  ;;  %v1130_v32 = vpop.f32.mrf.mxu0  ;;  %v1162_v37 = vpop.f32.mrf.mxu1 }
  0xf5   : > { %919 = vst.msk [vmem:[%s1359_s6 + $0x60] sm:$0xff] %vm906_vm1, %v854_v25  ;;  %v857_v33 = vadd.f32 %v1351_v38, %v786_v26  ;;  %v784_v34 = vmul.f32 %v1346_v35, %v713_v27  ;;  %v718_v36 = vmax.f32 %v1130_v32, 0.0  ;;  %v816_v40 = vmul.f32 %v1346_v35, %v745_v31 }
  0xf6   : > { %951 = vst.msk [vmem:[%s1359_s6 + $0x160] sm:$0xff] %vm906_vm1, %v886_v29  ;;  %v889_v39 = vadd.f32 %v1351_v38, %v818_v30  ;;  %v750_v41 = vmax.f32 %v1162_v37, 0.0  ;;  %v509_v42 = vpop.f32.mrf.mxu0  ;;  %v637_v46 = vpop.f32.mrf.mxu1 }
  0xf7   : > { %922 = vst.msk [vmem:[%s1359_s6 + $0x78] sm:$0xff] %vm906_vm1, %v857_v33  ;;  %v855_v43 = vadd.f32 %v1351_v38, %v784_v34  ;;  %v789_v44 = vmul.f32 %v1346_v35, %v718_v36  ;;  %v716_v45 = vmax.f32 %v509_v42, 0.0  ;;  %v887_v47 = vadd.f32 %v1351_v38, %v816_v40 }
  0xf8   : > { %954 = vst.msk [vmem:[%s1359_s6 + $0x178] sm:$0xff] %vm906_vm1, %v889_v39  ;;  %v821_v48 = vmul.f32 %v1346_v35, %v750_v41  ;;  %v748_v49 = vmax.f32 %v637_v46, 0.0  ;;  %v1131_v50 = vpop.f32.mrf.mxu0  ;;  %v1163_v54 = vpop.f32.mrf.mxu1 }
  0xf9   : > { %920 = vst.msk [vmem:[%s1359_s6 + $0x68] sm:$0xff] %vm906_vm1, %v855_v43  ;;  %v860_v51 = vadd.f32 %v1351_v38, %v789_v44  ;;  %v787_v52 = vmul.f32 %v1346_v35, %v716_v45  ;;  %v719_v53 = vmax.f32 %v1131_v50, 0.0  ;;  %952 = vst.msk [vmem:[%s1359_s6 + $0x168] sm:$0xff] %vm906_vm1, %v887_v47  ;;  %v751_v57 = vmax.f32 %v1163_v54, 0.0 }
  0xfa   : > { %v892_v55 = vadd.f32 %v1351_v38, %v821_v48  ;;  %v819_v56 = vmul.f32 %v1346_v35, %v748_v49  ;;  %v512_v58 = vpop.f32.mrf.mxu0  ;;  %v640_v62 = vpop.f32.mrf.mxu1 }
  0xfb   : > { %925 = vst.msk [vmem:[%s1359_s6 + $0x90] sm:$0xff] %vm906_vm1, %v860_v51  ;;  %v858_v59 = vadd.f32 %v1351_v38, %v787_v52  ;;  %v790_v60 = vmul.f32 %v1346_v35, %v719_v53  ;;  %v717_v61 = vmax.f32 %v512_v58, 0.0  ;;  %v822_v0 = vmul.f32 %v1346_v35, %v751_v57 }
  0xfc   : > { %957 = vst.msk [vmem:[%s1359_s6 + $0x190] sm:$0xff] %vm906_vm1, %v892_v55  ;;  %v890_v63 = vadd.f32 %v1351_v38, %v819_v56  ;;  %v749_v1 = vmax.f32 %v640_v62, 0.0  ;;  %v1134_v2 = vpop.f32.mrf.mxu0  ;;  %v1166_v6 = vpop.f32.mrf.mxu1 }
  0xfd   : > { %923 = vst.msk [vmem:[%s1359_s6 + $0x80] sm:$0xff] %vm906_vm1, %v858_v59  ;;  %v861_v3 = vadd.f32 %v1351_v38, %v790_v60  ;;  %v788_v4 = vmul.f32 %v1346_v35, %v717_v61  ;;  %v722_v5 = vmax.f32 %v1134_v2, 0.0  ;;  %v893_v7 = vadd.f32 %v1351_v38, %v822_v0 }
  0xfe   : > { %955 = vst.msk [vmem:[%s1359_s6 + $0x180] sm:$0xff] %vm906_vm1, %v890_v63  ;;  %v820_v8 = vmul.f32 %v1346_v35, %v749_v1  ;;  %v754_v9 = vmax.f32 %v1166_v6, 0.0  ;;  %v525_v10 = vpop.f32.mrf.mxu0  ;;  %v653_v14 = vpop.f32.mrf.mxu1 }
  0xff   : > { %926 = vst.msk [vmem:[%s1359_s6 + $0x98] sm:$0xff] %vm906_vm1, %v861_v3  ;;  %v859_v11 = vadd.f32 %v1351_v38, %v788_v4  ;;  %v793_v12 = vmul.f32 %v1346_v35, %v722_v5  ;;  %v720_v13 = vmax.f32 %v525_v10, 0.0  ;;  %958 = vst.msk [vmem:[%s1359_s6 + $0x198] sm:$0xff] %vm906_vm1, %v893_v7  ;;  %v752_v17 = vmax.f32 %v653_v14, 0.0 }
 0x100   : > { %v891_v15 = vadd.f32 %v1351_v38, %v820_v8  ;;  %v825_v16 = vmul.f32 %v1346_v35, %v754_v9  ;;  %v1135_v18 = vpop.f32.mrf.mxu0  ;;  %v1167_v22 = vpop.f32.mrf.mxu1 }
 0x101   : > { %924 = vst.msk [vmem:[%s1359_s6 + $0x88] sm:$0xff] %vm906_vm1, %v859_v11  ;;  %v864_v19 = vadd.f32 %v1351_v38, %v793_v12  ;;  %v791_v20 = vmul.f32 %v1346_v35, %v720_v13  ;;  %v723_v21 = vmax.f32 %v1135_v18, 0.0  ;;  %v823_v24 = vmul.f32 %v1346_v35, %v752_v17 }
 0x102   : > { %956 = vst.msk [vmem:[%s1359_s6 + $0x188] sm:$0xff] %vm906_vm1, %v891_v15  ;;  %v896_v23 = vadd.f32 %v1351_v38, %v825_v16  ;;  %v755_v25 = vmax.f32 %v1167_v22, 0.0  ;;  %v528_v26 = vpop.f32.mrf.mxu0  ;;  %v656_v30 = vpop.f32.mrf.mxu1 }
 0x103   : > { %929 = vst.msk [vmem:[%s1359_s6 + $0xb0] sm:$0xff] %vm906_vm1, %v864_v19  ;;  %v862_v27 = vadd.f32 %v1351_v38, %v791_v20  ;;  %v794_v28 = vmul.f32 %v1346_v35, %v723_v21  ;;  %v721_v29 = vmax.f32 %v528_v26, 0.0  ;;  %v894_v31 = vadd.f32 %v1351_v38, %v823_v24 }
 0x104   : > { %961 = vst.msk [vmem:[%s1359_s6 + $0x1b0] sm:$0xff] %vm906_vm1, %v896_v23  ;;  %v826_v32 = vmul.f32 %v1346_v35, %v755_v25  ;;  %v753_v33 = vmax.f32 %v656_v30, 0.0  ;;  %v1138_v34 = vpop.f32.mrf.mxu0  ;;  %v1170_v40 = vpop.f32.mrf.mxu1 }
 0x105   : > { %927 = vst.msk [vmem:[%s1359_s6 + $0xa0] sm:$0xff] %vm906_vm1, %v862_v27  ;;  %v865_v36 = vadd.f32 %v1351_v38, %v794_v28  ;;  %v792_v37 = vmul.f32 %v1346_v35, %v721_v29  ;;  %v726_v39 = vmax.f32 %v1138_v34, 0.0  ;;  %959 = vst.msk [vmem:[%s1359_s6 + $0x1a0] sm:$0xff] %vm906_vm1, %v894_v31  ;;  %v758_v43 = vmax.f32 %v1170_v40, 0.0 }
 0x106   : > { %v897_v41 = vadd.f32 %v1351_v38, %v826_v32  ;;  %v824_v42 = vmul.f32 %v1346_v35, %v753_v33  ;;  %v541_v44 = vpop.f32.mrf.mxu0  ;;  %v669_v48 = vpop.f32.mrf.mxu1 }
 0x107   : > { %930 = vst.msk [vmem:[%s1359_s6 + $0xb8] sm:$0xff] %vm906_vm1, %v865_v36  ;;  %v863_v45 = vadd.f32 %v1351_v38, %v792_v37  ;;  %v797_v46 = vmul.f32 %v1346_v35, %v726_v39  ;;  %v724_v47 = vmax.f32 %v541_v44, 0.0  ;;  %v829_v50 = vmul.f32 %v1346_v35, %v758_v43 }
 0x108   : > { %962 = vst.msk [vmem:[%s1359_s6 + $0x1b8] sm:$0xff] %vm906_vm1, %v897_v41  ;;  %v895_v49 = vadd.f32 %v1351_v38, %v824_v42  ;;  %v756_v51 = vmax.f32 %v669_v48, 0.0  ;;  %v1139_v52 = vpop.f32.mrf.mxu0  ;;  %v1171_v56 = vpop.f32.mrf.mxu1 }
 0x109   : > { %928 = vst.msk [vmem:[%s1359_s6 + $0xa8] sm:$0xff] %vm906_vm1, %v863_v45  ;;  %v868_v53 = vadd.f32 %v1351_v38, %v797_v46  ;;  %v795_v54 = vmul.f32 %v1346_v35, %v724_v47  ;;  %v727_v55 = vmax.f32 %v1139_v52, 0.0  ;;  %v900_v57 = vadd.f32 %v1351_v38, %v829_v50 }
 0x10a   : > { %960 = vst.msk [vmem:[%s1359_s6 + $0x1a8] sm:$0xff] %vm906_vm1, %v895_v49  ;;  %v827_v58 = vmul.f32 %v1346_v35, %v756_v51  ;;  %v759_v59 = vmax.f32 %v1171_v56, 0.0  ;;  %v544_v60 = vpop.f32.mrf.mxu0  ;;  %v672_v0 = vpop.f32.mrf.mxu1 }
 0x10b   : > { %933 = vst.msk [vmem:[%s1359_s6 + $0xd0] sm:$0xff] %vm906_vm1, %v868_v53  ;;  %v866_v61 = vadd.f32 %v1351_v38, %v795_v54  ;;  %v798_v62 = vmul.f32 %v1346_v35, %v727_v55  ;;  %v725_v63 = vmax.f32 %v544_v60, 0.0  ;;  %965 = vst.msk [vmem:[%s1359_s6 + $0x1d0] sm:$0xff] %vm906_vm1, %v900_v57  ;;  %v757_v3 = vmax.f32 %v672_v0, 0.0 }
 0x10c   : > { %v898_v1 = vadd.f32 %v1351_v38, %v827_v58  ;;  %v830_v2 = vmul.f32 %v1346_v35, %v759_v59  ;;  %v1142_v4 = vpop.f32.mrf.mxu0  ;;  %v1174_v8 = vpop.f32.mrf.mxu1 }
 0x10d   : > { %931 = vst.msk [vmem:[%s1359_s6 + $0xc0] sm:$0xff] %vm906_vm1, %v866_v61  ;;  %v869_v5 = vadd.f32 %v1351_v38, %v798_v62  ;;  %v796_v6 = vmul.f32 %v1346_v35, %v725_v63  ;;  %v730_v7 = vmax.f32 %v1142_v4, 0.0  ;;  %v828_v10 = vmul.f32 %v1346_v35, %v757_v3 }
 0x10e   : > { %963 = vst.msk [vmem:[%s1359_s6 + $0x1c0] sm:$0xff] %vm906_vm1, %v898_v1  ;;  %v901_v9 = vadd.f32 %v1351_v38, %v830_v2  ;;  %v762_v11 = vmax.f32 %v1174_v8, 0.0  ;;  %v557_v12 = vpop.f32.mrf.mxu0  ;;  %v685_v16 = vpop.f32.mrf.mxu1 }
 0x10f   : > { %934 = vst.msk [vmem:[%s1359_s6 + $0xd8] sm:$0xff] %vm906_vm1, %v869_v5  ;;  %v867_v13 = vadd.f32 %v1351_v38, %v796_v6  ;;  %v801_v14 = vmul.f32 %v1346_v35, %v730_v7  ;;  %v728_v15 = vmax.f32 %v557_v12, 0.0  ;;  %v899_v17 = vadd.f32 %v1351_v38, %v828_v10 }
 0x110   : > { %966 = vst.msk [vmem:[%s1359_s6 + $0x1d8] sm:$0xff] %vm906_vm1, %v901_v9  ;;  %v833_v18 = vmul.f32 %v1346_v35, %v762_v11  ;;  %v760_v19 = vmax.f32 %v685_v16, 0.0  ;;  %v1143_v20 = vpop.f32.mrf.mxu0  ;;  %v1175_v24 = vpop.f32.mrf.mxu1 }
 0x111   : > { %932 = vst.msk [vmem:[%s1359_s6 + $0xc8] sm:$0xff] %vm906_vm1, %v867_v13  ;;  %v872_v21 = vadd.f32 %v1351_v38, %v801_v14  ;;  %v799_v22 = vmul.f32 %v1346_v35, %v728_v15  ;;  %v731_v23 = vmax.f32 %v1143_v20, 0.0  ;;  %964 = vst.msk [vmem:[%s1359_s6 + $0x1c8] sm:$0xff] %vm906_vm1, %v899_v17  ;;  %v763_v27 = vmax.f32 %v1175_v24, 0.0 }
 0x112   : > { %v904_v25 = vadd.f32 %v1351_v38, %v833_v18  ;;  %v831_v26 = vmul.f32 %v1346_v35, %v760_v19  ;;  %v560_v28 = vpop.f32.mrf.mxu0  ;;  %v688_v32 = vpop.f32.mrf.mxu1 }
 0x113   : > { %937 = vst.msk [vmem:[%s1359_s6 + $0xf0] sm:$0xff] %vm906_vm1, %v872_v21  ;;  %v870_v29 = vadd.f32 %v1351_v38, %v799_v22  ;;  %v802_v30 = vmul.f32 %v1346_v35, %v731_v23  ;;  %v729_v31 = vmax.f32 %v560_v28, 0.0  ;;  %v834_v34 = vmul.f32 %v1346_v35, %v763_v27 }
 0x114   : > { %969 = vst.msk [vmem:[%s1359_s6 + $0x1f0] sm:$0xff] %vm906_vm1, %v904_v25  ;;  %v902_v33 = vadd.f32 %v1351_v38, %v831_v26  ;;  %v761_v36 = vmax.f32 %v688_v32, 0.0 }
 0x115   : > { %935 = vst.msk [vmem:[%s1359_s6 + $0xe0] sm:$0xff] %vm906_vm1, %v870_v29  ;;  %v873_v37 = vadd.f32 %v1351_v38, %v802_v30  ;;  %v800_v39 = vmul.f32 %v1346_v35, %v729_v31  ;;  %v905_v40 = vadd.f32 %v1351_v38, %v834_v34 }
 0x116   : > { %967 = vst.msk [vmem:[%s1359_s6 + $0x1e0] sm:$0xff] %vm906_vm1, %v902_v33  ;;  %v832_v41 = vmul.f32 %v1346_v35, %v761_v36 }
 0x117   : > { %938 = vst.msk [vmem:[%s1359_s6 + $0xf8] sm:$0xff] %vm906_vm1, %v873_v37  ;;  %v871_v42 = vadd.f32 %v1351_v38, %v800_v39  ;;  %970 = vst.msk [vmem:[%s1359_s6 + $0x1f8] sm:$0xff] %vm906_vm1, %v905_v40 }
 0x118   : > { %v903_v43 = vadd.f32 %v1351_v38, %v832_v41 }
 0x119   : > { %936 = vst.msk [vmem:[%s1359_s6 + $0xe8] sm:$0xff] %vm906_vm1, %v871_v42 }
 0x11a   : > { %968 = vst.msk [vmem:[%s1359_s6 + $0x1e8] sm:$0xff] %vm906_vm1, %v903_v43 }
 0x11b PF: > { %s14_s15 = sadd.s32 1, %s1196_s15  }
 0x11c   : > { %p11_p4 = scmp.ge.s32.totalorder %s14_s15, 4  }
 0x11e   :  { %13 = sbr.rel (!%p11_p4) target bundleno = 1 (0x1), region = 66 }

</bundles_post_ra>
